<compile_context>
chip_gen: v7x
topology: tpu7x:2x2x1
jax: 0.10.0
libtpu: 0.0.40
codegen_flags: <defaults>
</compile_context>

<pallas_src>
import functools

import jax
import jax.numpy as jnp
from jax.experimental import pallas as pl
from jax.experimental.pallas import tpu as pltpu


def _round_up(x, m):
    return (x + m - 1) // m * m


# ----------------------------------------------------------------------------
# Pallas kernel
# ----------------------------------------------------------------------------
def _rgb_uncertainty_kernel(out_ref, tgt_ref, beta_ref, o_ref, acc_ref, *,
                            total_b, tb, steps, n_blocks, inv_c, inv_n,
                            use_l1):
    """One (parallel-slice, batch-block) step of the uncertainty loss.

    out_ref/tgt_ref: (C, tb)   predictions / targets, batch on the lane axis
    beta_ref:        (1, tb)   per-sample uncertainty
    o_ref:           (1, 128)  this parallel slice's partial loss (broadcast)
    acc_ref:         (1, 128)  running partial sum (same value in every lane)
    """
    p = pl.program_id(0)       # parallel (TensorCore) slice
    j = pl.program_id(1)       # reduction step within the slice

    @pl.when(j == 0)
    def _():
        acc_ref[...] = jnp.zeros_like(acc_ref)

    # Logical block id; clamp must match the in_specs index_map so the lane
    # validity mask lines up with the data that was actually DMA'd.
    flat_blk = p * steps + j
    blk = jnp.minimum(flat_blk, n_blocks - 1)
    base = blk * tb
    lane = jax.lax.broadcasted_iota(jnp.int32, (1, tb), 1)
    # Masks both the ragged batch tail and duplicated (clamped) overhang blocks.
    valid = jnp.logical_and(flat_blk < n_blocks, base + lane < total_b)

    diff = out_ref[...].astype(jnp.float32) - tgt_ref[...].astype(jnp.float32)
    err = jnp.abs(diff) if use_l1 else diff * diff             # (C, tb)   VPU
    ch_mean = jnp.sum(err, axis=0, keepdims=True) * inv_c      # (1, tb)   XLU (not MXU)

    beta = beta_ref[...].astype(jnp.float32)                   # (1, tb)
    # Select BEFORE log/reciprocal so garbage lanes never produce NaN/Inf.
    safe_beta = jnp.where(valid, beta, 1.0)
    term = (jnp.where(valid, ch_mean, 0.0)
            * pl.reciprocal(safe_beta, approx=False)           # EUP slot
            + jnp.log(safe_beta))                              # log(1)=0 when masked
    acc_ref[...] += jnp.sum(term)                              # scalar broadcast into acc

    @pl.when(j == pl.num_programs(1) - 1)
    def _():
        o_ref[...] = (acc_ref[...] * inv_n).astype(o_ref.dtype)


# ----------------------------------------------------------------------------
# Wrapper (layout plumbing only: transpose + free reshapes; math is in-kernel)
# ----------------------------------------------------------------------------
def rgb_with_uncertainty(outputs, targets, betas, *, use_l1=True,
                         block_b=65536, num_cores=2):
    """outputs, targets: (B, C); betas: (B,) > 0.  Returns the scalar loss.

    block_b: batch-lane tile (multiple of 128). VMEM ~192*block_b bytes for f32
      inputs (double buffered); sweep 32768..262144 per TPU generation.
    num_cores: parallel grid slices (2 uses both TensorCores on v7x; harmless
      on single-core v5e/v6e).
    """
    B, C = outputs.shape
    assert targets.shape == (B, C)
    assert betas.shape == (B,)
    assert block_b % 128 == 0 and block_b > 0

    # Lane-dense layout: batch -> 128-lane axis, channels -> sublanes.
    # Native dtype passthrough; no jnp.pad (ragged tail is masked in-kernel).
    out_t = jnp.transpose(outputs)           # (C, B)
    tgt_t = jnp.transpose(targets)           # (C, B)
    beta_row = betas.reshape(1, B)           # (1, B) — free reshape

    tb = min(block_b, _round_up(B, 128))
    n_blocks = pl.cdiv(B, tb)
    n_par = max(1, min(num_cores, n_blocks))
    steps = pl.cdiv(n_blocks, n_par)

    def in_idx(p, j):
        # Clamp so DMAs of overhang grid points (n_par*steps > n_blocks) stay
        # in-bounds; those blocks are fully masked inside the kernel.
        return (0, jnp.minimum(p * steps + j, n_blocks - 1))

    kernel = functools.partial(
        _rgb_uncertainty_kernel, total_b=B, tb=tb, steps=steps,
        n_blocks=n_blocks, inv_c=1.0 / C, inv_n=1.0 / B, use_l1=use_l1)

    partials = pl.pallas_call(
        kernel,
        out_shape=jax.ShapeDtypeStruct((1, 128 * n_par), jnp.float32),
        grid=(n_par, steps),
        in_specs=[
            pl.BlockSpec((C, tb), in_idx),
            pl.BlockSpec((C, tb), in_idx),
            pl.BlockSpec((1, tb), in_idx),
        ],
        out_specs=pl.BlockSpec((1, 128), lambda p, j: (0, p)),
        scratch_shapes=[pltpu.VMEM((1, 128), jnp.float32)],
        compiler_params=pltpu.CompilerParams(
            dimension_semantics=("parallel", "arbitrary"),
            vmem_limit_bytes=32 * 1024 * 1024),
    )(out_t, tgt_t, beta_row)

    # Each slice's 128-lane block holds one partial (broadcast across lanes);
    # the tiny cross-core add happens here in the wrapper.
    return jnp.sum(partials.reshape(n_par, 128)[:, 0])


# ----------------------------------------------------------------------------
# Pure-JAX reference (mirrors the PyTorch module exactly)
# ----------------------------------------------------------------------------
def rgb_with_uncertainty_ref(outputs, targets, betas, *, use_l1=True):
    o = outputs.astype(jnp.float32)
    t = targets.astype(jnp.float32)
    err = jnp.abs(o - t) if use_l1 else (o - t) ** 2
    weighted = jnp.mean(err, axis=-1) / betas
    return jnp.mean(weighted) + jnp.mean(jnp.log(betas))


if __name__ == "__main__":
    key = jax.random.PRNGKey(0)
    k_o, k_t, k_b = jax.random.split(key, 3)

    # Small shapes consistent with the module: outputs/targets (B, 3), betas (B,)
    cases = [
        (256, 65536),   # single exact tile
        (1536, 512),    # multi-block reduction + 2-way parallel axis (+ clamped block)
        (200, 65536),   # ragged tail tile handled by the in-kernel mask
    ]
    # TODO(synk): conf.get_bool('use_l1') has no config object here; both the L1
    # and MSE branches are exercised via the static `use_l1` flag.
    for B, block_b in cases:
        outputs = jax.random.normal(k_o, (B, 3), jnp.float32)
        targets = jax.random.normal(k_t, (B, 3), jnp.float32)
        betas = jax.random.uniform(k_b, (B,), jnp.float32, 0.5, 2.0)  # > 0 for log
        for use_l1 in (True, False):
            fn = jax.jit(functools.partial(rgb_with_uncertainty,
                                           use_l1=use_l1, block_b=block_b))
            got = jax.block_until_ready(fn(outputs, targets, betas))
            want = rgb_with_uncertainty_ref(outputs, targets, betas,
                                            use_l1=use_l1)
            assert jnp.allclose(got, want, rtol=1e-4, atol=1e-5), \
                (B, use_l1, got, want)

    print("KERNEL_OK")
</pallas_src>

<mosaic_0001>
module attributes {stable_mosaic.version = 11 : i64} {
  func.func @_rgb_uncertainty_kernel(%arg0: i32, %arg1: i32, %arg2: memref<3x256xf32, #tpu.memory_space<vmem>>, %arg3: memref<3x256xf32, #tpu.memory_space<vmem>>, %arg4: memref<1x256xf32, #tpu.memory_space<vmem>>, %arg5: memref<1x128xf32, #tpu.memory_space<vmem>>, %arg6: memref<1x128xf32, #tpu.memory_space<vmem>>) attributes {dimension_semantics = [#tpu.dimension_semantics<parallel>, #tpu.dimension_semantics<arbitrary>], iteration_bounds = array<i64: 1, 1>, scalar_prefetch = 0 : i64, scratch_operands = 1 : i64, tpu.core_type = #tpu.core_type<tc>, window_params = [{transform_indices = @transform_0, window_bounds = array<i64: 3, 256>}, {transform_indices = @transform_1, window_bounds = array<i64: 3, 256>}, {transform_indices = @transform_2, window_bounds = array<i64: 1, 256>}, {transform_indices = @transform_3, window_bounds = array<i64: 1, 128>}]} {
    %c0_i32 = arith.constant 0 : i32
    %0 = arith.cmpi eq, %arg1, %c0_i32 : i32
    %1 = arith.extui %0 : i1 to i32
    %c0_i32_0 = arith.constant 0 : i32
    %2 = arith.cmpi ne, %1, %c0_i32_0 : i32
    scf.if %2 {
      %cst_19 = arith.constant 0.000000e+00 : f32
      %43 = vector.broadcast %cst_19 : f32 to vector<1x128xf32>
      %c0_20 = arith.constant 0 : index
      %c0_21 = arith.constant 0 : index
      %44 = vector.load %arg6[%c0_20, %c0_21] : memref<1x128xf32, #tpu.memory_space<vmem>>, vector<1x128xf32>
      tpu.vector_store %arg6[%c0_20, %c0_21], %43 {strides = array<i32>} : memref<1x128xf32, #tpu.memory_space<vmem>>, vector<1x128xf32>,
    } else {
    }
    %c1_i32 = arith.constant 1 : i32
    %3 = arith.muli %arg0, %c1_i32 : i32
    %4 = arith.addi %3, %arg1 : i32
    %c0_i32_1 = arith.constant 0 : i32
    %5 = arith.minsi %4, %c0_i32_1 : i32
    %c256_i32 = arith.constant 256 : i32
    %6 = arith.muli %5, %c256_i32 : i32
    %7 = tpu.iota {dimensions = array<i32: 1>} : vector<1x256xi32>
    %c1_i32_2 = arith.constant 1 : i32
    %8 = arith.cmpi slt, %4, %c1_i32_2 : i32
    %9 = vector.broadcast %6 : i32 to vector<1x256xi32>
    %10 = arith.addi %9, %7 : vector<1x256xi32>
    %c256_i32_3 = arith.constant 256 : i32
    %11 = vector.broadcast %c256_i32_3 : i32 to vector<1x256xi32>
    %12 = arith.cmpi slt, %10, %11 : vector<1x256xi32>
    %13 = vector.broadcast %8 : i1 to vector<1x256xi1>
    %14 = arith.andi %13, %12 : vector<1x256xi1>
    %c0 = arith.constant 0 : index
    %c0_4 = arith.constant 0 : index
    %15 = vector.load %arg2[%c0, %c0_4] : memref<3x256xf32, #tpu.memory_space<vmem>>, vector<3x256xf32>
    %c0_5 = arith.constant 0 : index
    %c0_6 = arith.constant 0 : index
    %16 = vector.load %arg3[%c0_5, %c0_6] : memref<3x256xf32, #tpu.memory_space<vmem>>, vector<3x256xf32>
    %17 = arith.subf %15, %16 : vector<3x256xf32>
    %18 = math.absf %17 : vector<3x256xf32>
    %cst = arith.constant dense<0.000000e+00> : vector<256xf32>
    %19 = vector.multi_reduction <add>, %18, %cst [0] : vector<3x256xf32> to vector<256xf32>
    %20 = vector.shape_cast %19 : vector<256xf32> to vector<1x256xf32>
    %cst_7 = arith.constant 0.333333343 : f32
    %21 = vector.broadcast %cst_7 : f32 to vector<1x256xf32>
    %22 = arith.mulf %20, %21 : vector<1x256xf32>
    %c0_8 = arith.constant 0 : index
    %c0_9 = arith.constant 0 : index
    %23 = vector.load %arg4[%c0_8, %c0_9] : memref<1x256xf32, #tpu.memory_space<vmem>>, vector<1x256xf32>
    %cst_10 = arith.constant 1.000000e+00 : f32
    %24 = vector.broadcast %cst_10 : f32 to vector<1x256xf32>
    %25 = arith.select %14, %23, %24 : vector<1x256xi1>, vector<1x256xf32>
    %cst_11 = arith.constant 0.000000e+00 : f32
    %26 = vector.broadcast %cst_11 : f32 to vector<1x256xf32>
    %27 = arith.select %14, %22, %26 : vector<1x256xi1>, vector<1x256xf32>
    %28 = tpu.reciprocal %25 : vector<1x256xf32> -> vector<1x256xf32>
    %29 = arith.mulf %27, %28 : vector<1x256xf32>
    %30 = math.log %25 : vector<1x256xf32>
    %31 = arith.addf %29, %30 : vector<1x256xf32>
    %c0_12 = arith.constant 0 : index
    %c0_13 = arith.constant 0 : index
    %32 = vector.load %arg6[%c0_12, %c0_13] : memref<1x128xf32, #tpu.memory_space<vmem>>, vector<1x128xf32>
    %33 = vector.shape_cast %31 : vector<1x256xf32> to vector<1x1x256xf32>
    %cst_14 = arith.constant dense<0.000000e+00> : vector<1xf32>
    %34 = vector.multi_reduction <add>, %33, %cst_14 [1, 2] : vector<1x1x256xf32> to vector<1xf32>
    %35 = vector.shape_cast %34 : vector<1xf32> to vector<1x1x1xf32>
    %36 = vector.extract %35[0, 0, 0] : f32 from vector<1x1x1xf32>
    %37 = vector.broadcast %36 : f32 to vector<1x128xf32>
    %38 = arith.addf %32, %37 : vector<1x128xf32>
    %c0_15 = arith.constant 0 : index
    %c0_16 = arith.constant 0 : index
    %39 = vector.load %arg6[%c0_15, %c0_16] : memref<1x128xf32, #tpu.memory_space<vmem>>, vector<1x128xf32>
    tpu.vector_store %arg6[%c0_15, %c0_16], %38 {strides = array<i32>} : memref<1x128xf32, #tpu.memory_space<vmem>>, vector<1x128xf32>,
    %c0_i32_17 = arith.constant 0 : i32
    %40 = arith.cmpi eq, %arg1, %c0_i32_17 : i32
    %41 = arith.extui %40 : i1 to i32
    %c0_i32_18 = arith.constant 0 : i32
    %42 = arith.cmpi ne, %41, %c0_i32_18 : i32
    scf.if %42 {
      %c0_19 = arith.constant 0 : index
      %c0_20 = arith.constant 0 : index
      %43 = vector.load %arg6[%c0_19, %c0_20] : memref<1x128xf32, #tpu.memory_space<vmem>>, vector<1x128xf32>
      %cst_21 = arith.constant 3.906250e-03 : f32
      %44 = vector.broadcast %cst_21 : f32 to vector<1x128xf32>
      %45 = arith.mulf %43, %44 : vector<1x128xf32>
      %c0_22 = arith.constant 0 : index
      %c0_23 = arith.constant 0 : index
      %46 = vector.load %arg5[%c0_22, %c0_23] : memref<1x128xf32, #tpu.memory_space<vmem>>, vector<1x128xf32>
      tpu.vector_store %arg5[%c0_22, %c0_23], %45 {strides = array<i32>} : memref<1x128xf32, #tpu.memory_space<vmem>>, vector<1x128xf32>,
    } else {
    }
    return
  }
  func.func @transform_0(%arg0: i32, %arg1: i32) -> (i32, i32) {
    %c1_i32 = arith.constant 1 : i32
    %0 = arith.muli %arg0, %c1_i32 : i32
    %1 = arith.addi %0, %arg1 : i32
    %c0_i32 = arith.constant 0 : i32
    %2 = arith.minsi %1, %c0_i32 : i32
    %c0_i32_0 = arith.constant 0 : i32
    %c0_i32_1 = arith.constant 0 : i32
    return %c0_i32_0, %2 : i32, i32
  }
  func.func @transform_1(%arg0: i32, %arg1: i32) -> (i32, i32) {
    %c1_i32 = arith.constant 1 : i32
    %0 = arith.muli %arg0, %c1_i32 : i32
    %1 = arith.addi %0, %arg1 : i32
    %c0_i32 = arith.constant 0 : i32
    %2 = arith.minsi %1, %c0_i32 : i32
    %c0_i32_0 = arith.constant 0 : i32
    %c0_i32_1 = arith.constant 0 : i32
    return %c0_i32_0, %2 : i32, i32
  }
  func.func @transform_2(%arg0: i32, %arg1: i32) -> (i32, i32) {
    %c1_i32 = arith.constant 1 : i32
    %0 = arith.muli %arg0, %c1_i32 : i32
    %1 = arith.addi %0, %arg1 : i32
    %c0_i32 = arith.constant 0 : i32
    %2 = arith.minsi %1, %c0_i32 : i32
    %c0_i32_0 = arith.constant 0 : i32
    %c0_i32_1 = arith.constant 0 : i32
    return %c0_i32_0, %2 : i32, i32
  }
  func.func @transform_3(%arg0: i32, %arg1: i32) -> (i32, i32) {
    %c0_i32 = arith.constant 0 : i32
    %c0_i32_0 = arith.constant 0 : i32
    return %c0_i32, %arg0 : i32, i32
  }
}

</mosaic_0001>

<bundles_post_ra>
// kernel: rgb_with_uncertainty.1
= control target key start
LH: loop header
LB: loop body
LE: loop exit
PB: predicated region body
PF: predicated region fallthrough
CT: control target
= control target key end

     0   :  { %8 = vsyncpa [#allocation4], 0  ;;  %s334_s0 = inlined_call_operand.vmem [shape: f32[3,256], index: 0, kind: input, shape index: {}]   ;;  %s335_s1 = inlined_call_operand.hbm [shape: f32[3,256], index: 1, kind: input, shape index: {}]   ;;  %s336_s2 = inlined_call_operand.vmem [shape: f32[1,256], index: 2, kind: input, shape index: {}]   ;;  %s337_s3 = inlined_call_operand.hbm [shape: f32[1,128], index: 3, kind: output, shape index: {}]  }
   0x1   :  { %9 = vsyncpa [#allocation5], 0  ;;  %s281_s12 = smov [#allocation3]   ;;  %s233_s16 = scalar_lea.hbm %s335_s1, 128 }
   0x2   :  { %s36_s13 = sshll.u32 %s281_s12, 4  ;;  %p234_p0 = scmp.ne.s32.totalorder %s335_s1, %s233_s16  ;;  %s37_s13 = int_to_ptr.vmem [resolvable:$true] %s36_s13 }
   0x3   :  { %p237_p1 = scmp.lt.u32.totalorder %s233_s16, %s335_s1 }
   0x5   :  { %p239_p2 = pnand %p237_p1, %p234_p0 }
   0x7   :  { %242 = shalt.err (!%p239_p2)
}
   0x8   :  { %s243_s21 = scalar_lea.vmem %s37_s13, 128  ;;  %p248_p4 = scmp.lt.s32.totalorder %s37_s13, %s37_s13 }
   0x9   :  { %p244_p3 = scmp.ne.s32.totalorder %s37_s13, %s243_s21  ;;  %p249_p5 = scmp.lt.s32.totalorder %s243_s21, %s243_s21 }
   0xb   :  { %p250_p6 = por %p249_p5, %p248_p4 }
   0xd   :  { %p251_p7 = pnand %p250_p6, %p244_p3 }
   0xf   :  { %254 = shalt.err (!%p251_p7)
}
  0x10   :  { %39 = dma.hbm_to_vmem [thread:$0]  %s335_s1, 128, %s37_s13, [#allocation4]  }
  0x11   :  { %277 = dma.done.wait [#allocation4], 128  }
  0x12   :  { %278 = vsyncadd [#allocation4], 4294967168  ;;  %v147_v0 = vlaneseq  ;;  %v121_v4 = vld [vmem:[%s334_s0] sm:$0x77]  ;;  %vm128_vm0 = vcmask 1042432   ;;  %vm172_vm1 = vcmask 1040384  }
  0x13   :  { %v122_v5 = vld [vmem:[#allocation3] sm:$0x77]  ;;  %v282_v41 = vmov 0.0   ;;  %s283_s1 = smov [#allocation6]  }
  0x14   :  { %v148_v1 = vshrl.u32 %v147_v0, 7  ;;  %v145_v6 = vld [vmem:[%s336_s2] sm:$0x3]  ;;  %v123_v7 = vsub.f32 %v121_v4, %v122_v5  ;;  %102 = vst [vmem:[#allocation2] sm:$0x1] %v282_v41  ;;  %s200_s2 = sshll.u32 %s283_s1, 4  ;;  %s201_s2 = int_to_ptr.vmem [resolvable:$true] %s200_s2 }
  0x15   :  { %s255_s28 = scalar_lea.vmem %s201_s2, 16  ;;  %s259_s29 = scalar_lea.vmem %s201_s2, 32 }
  0x16   :  { %v149_v2 = vsub.s32 0, %v148_v1  ;;  %v153_v3 = vsub.s32 1, %v148_v1  ;;  %v124_v9 = vand.u32 2147483647, %v123_v7  ;;  %p256_p8 = scmp.ne.s32.totalorder %s201_s2, %s255_s28  ;;  %p260_p9 = scmp.lt.s32.totalorder %s201_s2, %s201_s2 }
  0x17   :  { %p261_p10 = scmp.lt.s32.totalorder %s259_s29, %s255_s28 }
  0x18   :  { %v150_v8 = vrot.slane %v145_v6, %v149_v2  ;;  %v154_v10 = vrot.slane %v145_v6, %v153_v3  ;;  %v126_v11 = vcombine.high %v124_v9, %v124_v9  ;;  %v129_v12 = vsel %vm128_vm0, %v124_v9, 0.0 }
  0x19   :  { %v130_v13 = vrot.slane %v129_v12, 4  ;;  %p262_p11 = por %p261_p10, %p260_p9 }
  0x1a   :  { %225 = vlog2.f32 %v150_v8  ;;  %v136_v14 = vsel %vm128_vm0, %v126_v11, 0.0 }
  0x1b   :  { %227 = vrcp.f32 %v150_v8  ;;  %v131_v15 = vadd.f32 %v130_v13, %v129_v12  ;;  %v137_v16 = vrot.slane %v136_v14, 4  ;;  %v171_v49 = vld [vmem:[#allocation2] sm:$0x1]  ;;  %p263_p12 = pnand %p262_p11, %p256_p8 }
  0x1c   :  { %229 = vlog2.f32 %v154_v10 }
  0x1d   :  { %231 = vrcp.f32 %v154_v10  ;;  %v132_v17 = vrot.slane %v131_v15, 2  ;;  %v138_v18 = vadd.f32 %v137_v16, %v136_v14 }
  0x1f   :  { %v133_v19 = vadd.f32 %v132_v17, %v131_v15  ;;  %v139_v20 = vrot.slane %v138_v18, 2 }
  0x21   :  { %v134_v21 = vrot.slane %v133_v19, 1  ;;  %v140_v22 = vadd.f32 %v139_v20, %v138_v18 }
  0x23   :  { %v135_v25 = vadd.f32 %v134_v21, %v133_v19  ;;  %v141_v26 = vrot.slane %v140_v22, 1 }
  0x24   :  { %v226_v23 = vpop.eup %225 }
  0x25   :  { %v228_v24 = vpop.eup %227  ;;  %v142_v28 = vadd.f32 %v141_v26, %v140_v22  ;;  %v143_v29 = vmul.f32 0.33333334, %v135_v25  ;;  %v166_v30 = vmul.f32 0.6931472, %v226_v23 }
  0x26   :  { %v230_v27 = vpop.eup %229 }
  0x27   :  { %v232_v31 = vpop.eup %231  ;;  %v144_v32 = vmul.f32 0.33333334, %v142_v28  ;;  %v163_v33 = vmul.f32 %v228_v24, %v143_v29  ;;  %v168_v34 = vmul.f32 0.6931472, %v230_v27 }
  0x29   :  { %v164_v35 = vmul.f32 %v232_v31, %v144_v32  ;;  %v169_v36 = vadd.f32 %v166_v30, %v163_v33 }
  0x2b   :  { %v170_v37 = vadd.f32 %v168_v34, %v164_v35  ;;  %v173_v38 = vsel %vm172_vm1, %v169_v36, 0.0 }
  0x2d   :  { %v174_v39 = vsel %vm172_vm1, %v170_v37, 0.0 }
  0x2e   :  { %v175_v40 = vadd.f32 %v174_v39, %v173_v38 }
  0x30   :  { %176 = vadd.xlane.f32.xlu0 %v175_v40 }
  0xbd   :  { %v177_v42 = vpop.xlane.xlu0 %176 }
  0xbe   :  { %v178_v43 = vrot.slane %v177_v42, 4 }
  0xc0   :  { %v179_v44 = vadd.f32 %v178_v43, %v177_v42 }
  0xc2   :  { %v180_v45 = vrot.slane %v179_v44, 2 }
  0xc4   :  { %v181_v46 = vadd.f32 %v180_v45, %v179_v44 }
  0xc6   :  { %v182_v47 = vrot.slane %v181_v46, 1 }
  0xc8   :  { %v183_v48 = vadd.f32 %v182_v47, %v181_v46 }
  0xca   :  { %220 = vpush %v183_v48 }
  0xfb   :  { %s221_s0 = spop %220 }
  0xfc   :  { %v185_v50 = vstv %s221_s0 }
  0xfd   :  { %v186_v51 = vadd.f32 %v185_v50, %v171_v49 }
  0xff   :  { %187 = vst [vmem:[#allocation2] sm:$0x1] %v186_v51 }
 0x106   :  { %v191_v52 = vld [vmem:[#allocation2] sm:$0x1] }
 0x107   :  { %v192_v53 = vmul.f32 0.00390625, %v191_v52 }
 0x109   :  { %193 = vst [vmem:[#allocation6] sm:$0x1] %v192_v53 }
 0x10a   :  { %266 = shalt.err (!%p263_p12)
}
 0x10b   :  { %s267_s5 = scalar_lea.hbm %s337_s3, 16 }
 0x10c   :  { %p268_p13 = scmp.ne.s32.totalorder %s337_s3, %s267_s5  ;;  %p271_p0 = scmp.lt.u32.totalorder %s267_s5, %s337_s3 }
 0x10e   :  { %p273_p1 = pnand %p271_p0, %p268_p13 }
 0x110   :  { %276 = shalt.err (!%p273_p1)
}
 0x111   :  { %203 = dma.vmem_to_hbm [thread:$0]  %s201_s2, 16, %s337_s3, [#allocation5]  }
 0x112   :  { %279 = dma.done.wait [#allocation5], 16  }
 0x113   :  { %280 = vsyncadd [#allocation5], 4294967280 }
 0x114   :  { %207 = vsyncpa [#allocation4], 1 }
 0x115   :  { %208 = vsyncpa [#allocation5], 1 }

</bundles_post_ra>
